<compile_context>
chip_gen: v7x
topology: tpu7x:2x2x1
jax: 0.10.0
libtpu: 0.0.40
codegen_flags: <defaults>
</compile_context>

<pallas_src>
import functools

import jax
import jax.numpy as jnp
from jax.experimental import pallas as pl
from jax.experimental.pallas import tpu as pltpu


def _round_up(x: int, m: int) -> int:
    return (x + m - 1) // m * m


@functools.lru_cache(maxsize=None)
def _vmem_capacity_bytes() -> int:
    """Per-core VMEM capacity; conservative (v7x-sized) fallback."""
    try:
        return int(pltpu.get_tpu_info().vmem_capacity_bytes)
    except Exception:  # query unavailable -> assume the smallest (64 MiB) VMEM
        return 64 * 1024 * 1024


def _default_tiles(vmem_cap: int):
    if vmem_cap >= 100 * 1024 * 1024:
        # v5e / v6e: 128 MiB VMEM -> big tiles to push arithmetic intensity
        # past the ~240 / ~650 FLOP/byte roofline crossover.
        return 512, 1024, 1024
    # v7x: only 64 MiB VMEM per TC, but 3.2 TB/s HBM -> moderate tiles already
    # make the kernel MXU-bound (~310 FLOP/byte needed).
    return 512, 1024, 512


# --- Kernels -----------------------------------------------------------------


def _linear_relu_kernel_multi_k(x_ref, w_ref, b_ref, o_ref, acc_ref):
    """Grid (i over M, j over N, k over K); K last so the accumulator tile
    stays resident across the whole reduction."""
    k = pl.program_id(2)

    @pl.when(k == 0)
    def _init():
        acc_ref[...] = jnp.zeros_like(acc_ref)

    acc_ref[...] += jnp.dot(
        x_ref[...], w_ref[...], preferred_element_type=jnp.float32
    )

    @pl.when(k == pl.num_programs(2) - 1)
    def _epilogue():
        # Bias add + ReLU once per output tile (VPU work hidden under MXU).
        out = jnp.maximum(acc_ref[...] + b_ref[...].astype(jnp.float32), 0.0)
        o_ref[...] = out.astype(o_ref.dtype)


def _linear_relu_kernel_single_k(x_ref, w_ref, b_ref, o_ref):
    """Whole K fits in one step: no scratch accumulator, no VMEM RMW traffic."""
    acc = jnp.dot(x_ref[...], w_ref[...], preferred_element_type=jnp.float32)
    out = jnp.maximum(acc + b_ref[...].astype(jnp.float32), 0.0)
    o_ref[...] = out.astype(o_ref.dtype)


# --- Wrapper -----------------------------------------------------------------


@functools.partial(jax.jit, static_argnames=("tm", "tn", "tk", "compute_dtype"))
def my_linear(x, weight, bias, *, tm=None, tn=None, tk=None,
              compute_dtype=jnp.bfloat16):
    """Pallas implementation of MyLinear.forward: relu(x @ weight + bias).

    x:      (M, K)   weight: (K, N)   bias: (N,)
    compute_dtype: dtype for the MXU operands (default bf16; pass jnp.float32
        or None for full-precision operands). Accumulation is always f32 and
        the output keeps x's dtype.
    """
    M, K = x.shape
    Kw, N = weight.shape
    assert K == Kw, (K, Kw)
    assert bias.shape == (N,), bias.shape

    out_dtype = x.dtype
    if compute_dtype is not None:
        x = x.astype(compute_dtype)
        weight = weight.astype(compute_dtype)

    # --- tile selection (per-generation defaults, clamped to problem size) ---
    vmem_cap = _vmem_capacity_bytes()
    d_tm, d_tn, d_tk = _default_tiles(vmem_cap)
    tm = d_tm if tm is None else tm
    tn = d_tn if tn is None else tn
    tk = d_tk if tk is None else tk

    itemsize = x.dtype.itemsize
    # bf16 packs 2 rows/sublane (int8/fp8: 4) -> match the native packed tile.
    m_align = {1: 32, 2: 16}.get(itemsize, 8)

    tm = min(_round_up(tm, m_align), _round_up(M, m_align))
    tn = min(_round_up(tn, 128), _round_up(N, 128))
    tk = min(_round_up(tk, 128), _round_up(K, 128))

    # v7x megacore: with a single M tile, split N into >= 2 "parallel" j-tiles
    # so both TensorCores get work (harmless extra grid steps elsewhere).
    n_aligned = _round_up(N, 128)
    if _round_up(M, tm) == tm and n_aligned >= 256:
        tn = min(tn, _round_up((n_aligned + 1) // 2, 128))

    Mp = _round_up(M, tm)
    Kp = _round_up(K, tk)
    Np = _round_up(N, tn)

    # Zero-pad only when misaligned (zeros contribute nothing, ReLU(0+b) is
    # sliced off); the aligned fast path is copy-free.
    if (Mp, Kp) != (M, K):
        x = jnp.pad(x, ((0, Mp - M), (0, Kp - K)))
    if (Kp, Np) != (K, N):
        weight = jnp.pad(weight, ((0, Kp - K), (0, Np - N)))
    bias2d = bias.reshape(1, N).astype(jnp.float32)
    if Np != N:
        bias2d = jnp.pad(bias2d, ((0, 0), (0, Np - N)))

    gm, gn, gk = Mp // tm, Np // tn, Kp // tk
    grid = (gm, gn, gk)

    if gk == 1:
        kernel = _linear_relu_kernel_single_k
        scratch_shapes = []
        acc_bytes = 0
    else:
        kernel = _linear_relu_kernel_multi_k
        scratch_shapes = [pltpu.VMEM((tm, tn), jnp.float32)]
        acc_bytes = tm * tn * 4

    x_size = x.dtype.itemsize
    w_size = weight.dtype.itemsize
    o_size = out_dtype.itemsize

    # Double-buffered pipeline footprint -> pick a safe VMEM limit per chip.
    footprint = (2 * tm * tk * x_size + 2 * tk * tn * w_size
                 + 2 * tm * tn * o_size + 2 * tn * 4 + acc_bytes)
    vmem_limit = max(32 * 1024 * 1024, footprint + 8 * 1024 * 1024)
    vmem_limit = int(min(vmem_limit, (vmem_cap * 3) // 4))

    cost = pl.CostEstimate(
        flops=2 * Mp * Np * Kp,
        transcendentals=0,
        bytes_accessed=(Mp * Kp * x_size + Kp * Np * w_size
                        + Np * 4 + Mp * Np * o_size),
    )

    out = pl.pallas_call(
        kernel,
        out_shape=jax.ShapeDtypeStruct((Mp, Np), out_dtype),
        grid_spec=pltpu.PrefetchScalarGridSpec(
            num_scalar_prefetch=0,
            grid=grid,
            in_specs=[
                pl.BlockSpec((tm, tk), lambda i, j, k: (i, k)),   # X tile
                pl.BlockSpec((tk, tn), lambda i, j, k: (k, j)),   # W tile
                pl.BlockSpec((1, tn), lambda i, j, k: (0, j)),    # bias row
            ],
            out_specs=pl.BlockSpec((tm, tn), lambda i, j, k: (i, j)),
            scratch_shapes=scratch_shapes,
        ),
        compiler_params=pltpu.CompilerParams(
            # M and N tiles are independent (megacore-shardable); K is the
            # resident-accumulator reduction.
            dimension_semantics=("parallel", "parallel", "arbitrary"),
            vmem_limit_bytes=vmem_limit,
        ),
        cost_estimate=cost,
    )(x, weight, bias2d)

    if (Mp, Np) != (M, N):
        out = out[:M, :N]
    return out


if __name__ == "__main__":
    # --- Small problem matching the PyTorch module's toy usage ---------------
    in_units, units = 32, 16
    batch = 8

    key = jax.random.PRNGKey(0)
    kx, kw, kb = jax.random.split(key, 3)
    x = jax.random.normal(kx, (batch, in_units), dtype=jnp.float32)
    weight = jax.random.normal(kw, (in_units, units), dtype=jnp.float32)
    bias = jax.random.normal(kb, (units,), dtype=jnp.float32)

    ref = jnp.maximum(x @ weight + bias, 0.0)

    # Exact f32-compute path.
    out_f32 = jax.block_until_ready(my_linear(x, weight, bias,
                                              compute_dtype=jnp.float32))
    assert out_f32.shape == (batch, units)
    assert out_f32.dtype == jnp.float32
    assert jnp.allclose(out_f32, ref, atol=1e-4, rtol=1e-4), "f32 test failed"

    # Default (bf16-compute, f32-accumulate) path: compare against the
    # bf16-rounded reference so only accumulation order differs.
    ref_bf16 = jnp.maximum(
        x.astype(jnp.bfloat16).astype(jnp.float32)
        @ weight.astype(jnp.bfloat16).astype(jnp.float32) + bias, 0.0)
    out_def = jax.block_until_ready(my_linear(x, weight, bias))
    assert out_def.dtype == jnp.float32
    assert jnp.allclose(out_def, ref_bf16, atol=1e-2, rtol=1e-2), \
        "default bf16 test failed"

    # --- Larger shape with small tile overrides: exercises the full (M, N, K)
    #     grid, the f32 accumulator init/epilogue and per-j bias tiles ---------
    M2, K2, N2 = 64, 512, 256
    kx2, kw2, kb2 = jax.random.split(jax.random.PRNGKey(1), 3)
    x2 = jax.random.normal(kx2, (M2, K2), dtype=jnp.float32)
    w2 = jax.random.normal(kw2, (K2, N2), dtype=jnp.float32)
    b2 = jax.random.normal(kb2, (N2,), dtype=jnp.float32)
    ref2 = jnp.maximum(x2 @ w2 + b2, 0.0)

    out2 = jax.block_until_ready(
        my_linear(x2, w2, b2, tm=32, tn=128, tk=256, compute_dtype=jnp.float32))
    assert jnp.allclose(out2, ref2, atol=1e-2, rtol=1e-3), "tiled f32 test failed"

    # Same problem on the default (bf16, auto-tiled, single-K-step) path.
    ref2_bf16 = jnp.maximum(
        x2.astype(jnp.bfloat16).astype(jnp.float32)
        @ w2.astype(jnp.bfloat16).astype(jnp.float32) + b2, 0.0)
    out2_def = jax.block_until_ready(my_linear(x2, w2, b2))
    assert jnp.allclose(out2_def, ref2_bf16, atol=5e-2, rtol=1e-2), \
        "default bf16 tiled test failed"

    print("KERNEL_OK")
</pallas_src>

<mosaic_0001>
module attributes {stable_mosaic.version = 11 : i64} {
  func.func @_linear_relu_kernel_single_k(%arg0: i32, %arg1: i32, %arg2: i32, %arg3: memref<8x128xf32, #tpu.memory_space<vmem>>, %arg4: memref<128x128xf32, #tpu.memory_space<vmem>>, %arg5: memref<1x128xf32, #tpu.memory_space<vmem>>, %arg6: memref<8x128xf32, #tpu.memory_space<vmem>>) attributes {dimension_semantics = [#tpu.dimension_semantics<parallel>, #tpu.dimension_semantics<parallel>, #tpu.dimension_semantics<arbitrary>], iteration_bounds = array<i64: 1, 1, 1>, scalar_prefetch = 0 : i64, scratch_operands = 0 : i64, tpu.core_type = #tpu.core_type<tc>, window_params = [{transform_indices = @transform_0, window_bounds = array<i64: 8, 128>}, {transform_indices = @transform_1, window_bounds = array<i64: 128, 128>}, {transform_indices = @transform_2, window_bounds = array<i64: 1, 128>}, {transform_indices = @transform_3, window_bounds = array<i64: 8, 128>}]} {
    %c0 = arith.constant 0 : index
    %c0_0 = arith.constant 0 : index
    %0 = vector.load %arg3[%c0, %c0_0] : memref<8x128xf32, #tpu.memory_space<vmem>>, vector<8x128xf32>
    %c0_1 = arith.constant 0 : index
    %c0_2 = arith.constant 0 : index
    %1 = vector.load %arg4[%c0_1, %c0_2] : memref<128x128xf32, #tpu.memory_space<vmem>>, vector<128x128xf32>
    %cst = arith.constant dense<0.000000e+00> : vector<8x128xf32>
    %2 = tpu.matmul %0, %1, %cst {dimension_numbers = #tpu.dot_dimension_numbers<[1], [0], [0], [1], [0, 0, 1, 1], [], []>} : vector<8x128xf32>, vector<128x128xf32>, vector<8x128xf32> -> vector<8x128xf32>
    %c0_3 = arith.constant 0 : index
    %c0_4 = arith.constant 0 : index
    %3 = vector.load %arg5[%c0_3, %c0_4] : memref<1x128xf32, #tpu.memory_space<vmem>>, vector<1x128xf32>
    %4 = vector.broadcast %3 : vector<1x128xf32> to vector<8x128xf32>
    %5 = arith.addf %2, %4 : vector<8x128xf32>
    %cst_5 = arith.constant 0.000000e+00 : f32
    %6 = vector.broadcast %cst_5 : f32 to vector<8x128xf32>
    %7 = arith.maximumf %5, %6 : vector<8x128xf32>
    %c0_6 = arith.constant 0 : index
    %c0_7 = arith.constant 0 : index
    %8 = vector.load %arg6[%c0_6, %c0_7] : memref<8x128xf32, #tpu.memory_space<vmem>>, vector<8x128xf32>
    tpu.vector_store %arg6[%c0_6, %c0_7], %7 {strides = array<i32>} : memref<8x128xf32, #tpu.memory_space<vmem>>, vector<8x128xf32>,
    return
  }
  func.func @transform_0(%arg0: i32, %arg1: i32, %arg2: i32) -> (i32, i32) {
    %c0_i32 = arith.constant 0 : i32
    return %arg0, %arg2 : i32, i32
  }
  func.func @transform_1(%arg0: i32, %arg1: i32, %arg2: i32) -> (i32, i32) {
    %c0_i32 = arith.constant 0 : i32
    return %arg2, %arg1 : i32, i32
  }
  func.func @transform_2(%arg0: i32, %arg1: i32, %arg2: i32) -> (i32, i32) {
    %c0_i32 = arith.constant 0 : i32
    %c0_i32_0 = arith.constant 0 : i32
    return %c0_i32, %arg1 : i32, i32
  }
  func.func @transform_3(%arg0: i32, %arg1: i32, %arg2: i32) -> (i32, i32) {
    %c0_i32 = arith.constant 0 : i32
    return %arg0, %arg1 : i32, i32
  }
}

</mosaic_0001>

<bundles_post_ra>
// kernel: my_linear.1
= control target key start
LH: loop header
LB: loop body
LE: loop exit
PB: predicated region body
PF: predicated region fallthrough
CT: control target
= control target key end

     0   :  { %v230_v3 = vmov 0.0|0.0   ;;  %vm231_vm0 = vmmov 0   ;;  %v232_v6 = vmov 0.0   ;;  %s320_s0 = inlined_call_operand.vmem [shape: f32[8,128], index: 0, kind: input, shape index: {}]   ;;  %s321_s1 = inlined_call_operand.vmem [shape: f32[128,128], index: 1, kind: input, shape index: {}]   ;;  %s322_s2 = inlined_call_operand.vmem [shape: f32[1,128], index: 2, kind: input, shape index: {}]   ;;  %s323_s3 = inlined_call_operand.hbm [shape: f32[8,128], index: 3, kind: output, shape index: {}]  }
   0x1   :  { %v16_v0 = vld [vmem:[%s321_s1] sm:$0xff]  ;;  %v17_v1 = vld [vmem:[%s321_s1 + $0x8] sm:$0xff]  ;;  %v18_v2 = vld [vmem:[%s321_s1 + $0x10] sm:$0xff]  ;;  %178 = vmatprep.subr.bf16.mxu0 %v230_v3  ;;  %175 = vmatprep.mubr.msk.f32.mxu0 %vm231_vm0, %v232_v6 }
   0x2   :  { %v179_v4 = vpack.c.bf16 %v17_v1, %v16_v0  ;;  %v19_v5 = vld [vmem:[%s321_s1 + $0x18] sm:$0xff]  ;;  %v20_v8 = vld [vmem:[%s321_s1 + $0x20] sm:$0xff]  ;;  %v21_v9 = vld [vmem:[%s321_s1 + $0x28] sm:$0xff] }
   0x3   :  { %v182_v7 = vpack.c.bf16 %v19_v5, %v18_v2 }
   0x4   :  { %180 = vmatpush3.bf16.msra.mxu0 %v179_v4 }
   0x5   :  { %181 = vmatprep.subr.bf16.mxu0 %v230_v3 }
   0x6   :  { %8 = vsyncpa [#allocation3], 0  ;;  %v185_v10 = vpack.c.bf16 %v21_v9, %v20_v8  ;;  %v22_v11 = vld [vmem:[%s321_s1 + $0x30] sm:$0xff]  ;;  %v23_v12 = vld [vmem:[%s321_s1 + $0x38] sm:$0xff]  ;;  %s233_s21 = smov [#allocation2]  }
   0x7   :  { %v188_v13 = vpack.c.bf16 %v23_v12, %v22_v11  ;;  %v24_v14 = vld [vmem:[%s321_s1 + $0x40] sm:$0xff]  ;;  %v25_v15 = vld [vmem:[%s321_s1 + $0x48] sm:$0xff]  ;;  %v26_v17 = vld [vmem:[%s321_s1 + $0x50] sm:$0xff]  ;;  %s117_s22 = sshll.u32 %s233_s21, 4  ;;  %s118_s22 = int_to_ptr.vmem [resolvable:$true] %s117_s22 }
   0x8   :  { %183 = vmatpush3.bf16.msra.mxu0 %v182_v7  ;;  %v191_v16 = vpack.c.bf16 %v25_v15, %v24_v14  ;;  %v27_v18 = vld [vmem:[%s321_s1 + $0x58] sm:$0xff]  ;;  %v28_v20 = vld [vmem:[%s321_s1 + $0x60] sm:$0xff]  ;;  %v29_v21 = vld [vmem:[%s321_s1 + $0x68] sm:$0xff]  ;;  %p211_p1 = scmp.lt.s32.totalorder %s118_s22, %s118_s22 }
   0x9   :  { %184 = vmatprep.subr.bf16.mxu0 %v230_v3  ;;  %v194_v19 = vpack.c.bf16 %v27_v18, %v26_v17  ;;  %v197_v22 = vpack.c.bf16 %v29_v21, %v28_v20  ;;  %v30_v23 = vld [vmem:[%s321_s1 + $0x70] sm:$0xff]  ;;  %v31_v24 = vld [vmem:[%s321_s1 + $0x78] sm:$0xff]  ;;  %v15_v26 = vld [vmem:[%s320_s0] sm:$0xff]  ;;  %s206_s1 = scalar_lea.vmem %s118_s22, 128 }
   0xa   :  { %v200_v25 = vpack.c.bf16 %v31_v24, %v30_v23  ;;  %v125_v27 = vld [vmem:[%s322_s2] ss:$0 sm:$0xff]  ;;  %p207_p0 = scmp.ne.s32.totalorder %s118_s22, %s206_s1  ;;  %p212_p2 = scmp.lt.s32.totalorder %s206_s1, %s206_s1 }
   0xc   :  { %186 = vmatpush3.bf16.msra.mxu0 %v185_v10  ;;  %p213_p3 = por %p212_p2, %p211_p1 }
   0xd   :  { %187 = vmatprep.subr.bf16.mxu0 %v230_v3 }
   0xe   :  { %p214_p4 = pnand %p213_p3, %p207_p0 }
  0x10   :  { %189 = vmatpush3.bf16.msra.mxu0 %v188_v13 }
  0x11   :  { %190 = vmatprep.subr.bf16.mxu0 %v230_v3 }
  0x14   :  { %192 = vmatpush3.bf16.msra.mxu0 %v191_v16 }
  0x15   :  { %193 = vmatprep.subr.bf16.mxu0 %v230_v3 }
  0x18   :  { %195 = vmatpush3.bf16.msra.mxu0 %v194_v19 }
  0x19   :  { %196 = vmatprep.subr.bf16.mxu0 %v230_v3 }
  0x1c   :  { %198 = vmatpush3.bf16.msra.mxu0 %v197_v22 }
  0x1d   :  { %199 = vmatprep.subr.bf16.mxu0 %v230_v3 }
  0x20   :  { %201 = vmatpush3.bf16.msra.mxu0 %v200_v25 }
  0x23   :  { %176 = vmatmul.mubr.f32.vlgmr.msra.gmra.mrb[0].mxu0 %v15_v26 }
  0xf6   :  { %v105_v28 = vpop.f32.mrb[0].mxu0 }
  0xf7   :  { %v106_v29 = vadd.f32 %v125_v27, %v105_v28  ;;  %v177_v30 = vpop.f32.mrb[1].mxu0 }
  0xf9   :  { %v109_v31 = vmax.f32 %v106_v29, 0.0 }
  0xfb   :  { %110 = vst [vmem:[#allocation2] sm:$0xff] %v109_v31 }
  0xfc   :  { %217 = shalt.err (!%p214_p4)
}
  0xfd   :  { %s218_s24 = scalar_lea.hbm %s323_s3, 128 }
  0xfe   :  { %p219_p5 = scmp.ne.s32.totalorder %s323_s3, %s218_s24  ;;  %p222_p6 = scmp.lt.u32.totalorder %s218_s24, %s323_s3 }
 0x100   :  { %p224_p7 = pnand %p222_p6, %p219_p5 }
 0x102   :  { %227 = shalt.err (!%p224_p7)
}
 0x103   :  { %120 = dma.vmem_to_hbm [thread:$0]  %s118_s22, 128, %s323_s3, [#allocation3]  }
 0x104   :  { %228 = dma.done.wait [#allocation3], 128  }
 0x105   :  { %229 = vsyncadd [#allocation3], 4294967168 }
 0x106   :  { %124 = vsyncpa [#allocation3], 1 }

</bundles_post_ra>
